<compile_context>
chip_gen: v7x
topology: tpu7x:2x2x1
jax: 0.10.0
libtpu: 0.0.40
codegen_flags: <defaults>
</compile_context>

<pallas_src>
import jax
import jax.numpy as jnp
from jax.experimental import pallas as pl
from jax.experimental.pallas import tpu as pltpu

KERNEL_SIZE = 2  # static, matches nn.Conv1d(kernel_size=2)


def _round_up(v, m):
    return ((v + m - 1) // m) * m


def _cdiv(a, b):
    return (a + b - 1) // b


def _tpu_budgets():
    """(per-buffer tile budget, scoped-VMEM limit, prefer >=2 batch tiles)."""
    try:
        vmem_cap = int(pltpu.get_tpu_info().vmem_capacity_bytes)
    except Exception:
        vmem_cap = 0
    if vmem_cap >= (96 << 20):        # v5e / v6e class: 128 MiB VMEM per TC
        return 16 << 20, 100 << 20, False
    if vmem_cap > 0:                  # v7x class: 64 MiB VMEM per TC, 2 TCs
        return 10 << 20, 48 << 20, True
    # Unknown chip: conservative settings that fit every generation.
    return 8 << 20, 48 << 20, True


def _conv1d_k2_kernel(x_ref, w_ref, o_ref):
    """Path A: full-L block.  y[:, j] = w0*x[:, j] + w1*x[:, j+1]."""
    x = x_ref[...]                        # (tn, L) f32 in VMEM
    w0 = w_ref[0]                         # SMEM scalar reads
    w1 = w_ref[1]
    lo = o_ref.shape[-1]                  # L - 1
    o_ref[...] = w0 * x[:, :lo] + w1 * x[:, 1:lo + 1]


def _conv1d_k2_halo_kernel(x_ref, xn_ref, w_ref, o_ref):
    """Path B: L-tiled block with a 1-column halo from the next L-tile.

    x_ref:  (tn, TL)  current L-tile (TL multiple of 128)
    xn_ref: (tn, 128) next L-tile's leading columns (only column 0 is used)
    o_ref:  (tn, TL)  output tile (ragged tail columns are clamped by Pallas)
    """
    x = x_ref[...]
    nxt = xn_ref[...][:, :1]              # (tn, 1) halo column
    w0 = w_ref[0]
    w1 = w_ref[1]
    tl = x.shape[-1]
    # Left-rotate by one lane on the XLU: shifted[:, j] = x[:, (j+1) % TL]
    shifted = pltpu.roll(x, shift=tl - 1, axis=1)
    col = jax.lax.broadcasted_iota(jnp.int32, x.shape, 1)
    shifted = jnp.where(col == tl - 1, nxt, shifted)   # patch wrap column with halo
    o_ref[...] = w0 * x + w1 * shifted


def conv1d_pallas(x_ncl, weight, *, per_buf_bytes=None, vmem_limit_bytes=None):
    """x_ncl: (N, 1, L) f32; weight: (1, 1, 2) f32. Returns (N, 1, L-1) f32."""
    n, c, l = x_ncl.shape
    assert c == 1, "module is defined with in_channels=1"
    k = weight.shape[-1]
    assert k == KERNEL_SIZE
    assert l >= k, "valid Conv1d needs L >= kernel_size"
    l_out = l - k + 1

    auto_buf, auto_limit, want_two_tiles = _tpu_budgets()
    per_buf = per_buf_bytes or auto_buf
    vmem_limit = vmem_limit_bytes or auto_limit

    x2d = x_ncl.reshape(n, l).astype(jnp.float32)      # channel squeeze (no copy)
    w1d = weight.reshape(k).astype(jnp.float32)

    cost = pl.CostEstimate(flops=3 * n * l_out, transcendentals=0,
                           bytes_accessed=4 * n * (l + l_out))
    w_spec = pl.BlockSpec(memory_space=pltpu.MemorySpace.SMEM)

    row_bytes = 4 * l
    tn_min = n if n < 8 else 8

    if tn_min * row_bytes <= per_buf:
        # ---------- Path A: 1-D batch grid, full L per block ----------
        if n <= 8:
            tn = n                                       # full-dim exemption
        else:
            tn = max(8, (per_buf // row_bytes) // 8 * 8)
            tn = min(tn, _round_up(n, 8))
            if want_two_tiles and n >= 16:               # keep >=2 tiles for 2 TCs
                tn = min(tn, max(8, _round_up(_cdiv(n, 2), 8)))
        grid = (_cdiv(n, tn),)

        out = pl.pallas_call(
            _conv1d_k2_kernel,
            out_shape=jax.ShapeDtypeStruct((n, l_out), jnp.float32),
            grid=grid,
            in_specs=[
                pl.BlockSpec((tn, l), lambda i: (i, 0)),
                w_spec,
            ],
            out_specs=pl.BlockSpec((tn, l_out), lambda i: (i, 0)),
            compiler_params=pltpu.CompilerParams(
                dimension_semantics=("parallel",),
                vmem_limit_bytes=vmem_limit),
            cost_estimate=cost,
        )(x2d, w1d)
    else:
        # ---------- Path B: 2-D (batch x length) grid with 1-column halo ----------
        tn = tn_min
        tl = max(128, (per_buf // (4 * tn)) // 128 * 128)
        tl = min(tl, _round_up(l_out, 128))
        blocks_per_tl = tl // 128
        max_col_block = (l - 1) // 128                   # last valid 128-wide block
        grid = (_cdiv(n, tn), _cdiv(l_out, tl))

        def x_map(i, ci):
            return (i, ci)

        def xn_map(i, ci):
            # First 128 columns of the NEXT L-tile; clamped when the halo is
            # past the array (only happens when those output columns don't exist).
            return (i, jnp.minimum((ci + 1) * blocks_per_tl, max_col_block))

        out = pl.pallas_call(
            _conv1d_k2_halo_kernel,
            out_shape=jax.ShapeDtypeStruct((n, l_out), jnp.float32),
            grid=grid,
            in_specs=[
                pl.BlockSpec((tn, tl), x_map),
                pl.BlockSpec((tn, 128), xn_map),
                w_spec,
            ],
            out_specs=pl.BlockSpec((tn, tl), lambda i, ci: (i, ci)),
            compiler_params=pltpu.CompilerParams(
                dimension_semantics=("parallel", "parallel"),
                vmem_limit_bytes=vmem_limit),
            cost_estimate=cost,
        )(x2d, x2d, w1d)

    return out.reshape(n, 1, l_out)


if __name__ == "__main__":
    # Deterministic parameters, per TestConv1d_2.init_weights(): all weights = 2.0
    weight = jnp.full((1, 1, KERNEL_SIZE), 2.0, dtype=jnp.float32)
    key = jax.random.PRNGKey(0)

    # Primary small case consistent with the module: (batch=2, channels=1, length=16).
    x = jax.random.normal(key, (2, 1, 16), dtype=jnp.float32)
    out = jax.block_until_ready(conv1d_pallas(x, weight))
    ref = 2.0 * x[:, :, :-1] + 2.0 * x[:, :, 1:]
    assert out.shape == (2, 1, 15), out.shape
    assert jnp.allclose(out, ref, atol=1e-6), "mismatch (path A, single block)"

    # Exercise the batch-tiled path with a ragged last row block (forced tiny budget).
    x2 = jax.random.normal(jax.random.fold_in(key, 1), (20, 1, 256), dtype=jnp.float32)
    out2 = jax.block_until_ready(conv1d_pallas(x2, weight, per_buf_bytes=8 * 1024))
    ref2 = 2.0 * x2[:, :, :-1] + 2.0 * x2[:, :, 1:]
    assert jnp.allclose(out2, ref2, atol=1e-6), "mismatch (path A, batch-tiled)"

    # Exercise the long-L halo path (forced tiny budget -> 2-D grid with halo).
    x3 = jax.random.normal(jax.random.fold_in(key, 2), (16, 1, 2048), dtype=jnp.float32)
    out3 = jax.block_until_ready(conv1d_pallas(x3, weight, per_buf_bytes=32 * 1024))
    ref3 = 2.0 * x3[:, :, :-1] + 2.0 * x3[:, :, 1:]
    assert jnp.allclose(out3, ref3, atol=1e-6), "mismatch (path B, L-tiled halo)"

    print("KERNEL_OK")
</pallas_src>

<mosaic_0001>
module attributes {stable_mosaic.version = 11 : i64} {
  func.func @_conv1d_k2_kernel(%arg0: i32, %arg1: memref<2x16xf32, #tpu.memory_space<vmem>>, %arg2: memref<2xf32, #tpu.memory_space<smem>>, %arg3: memref<2x15xf32, #tpu.memory_space<vmem>>) attributes {dimension_semantics = [#tpu.dimension_semantics<parallel>], iteration_bounds = array<i64: 1>, scalar_prefetch = 0 : i64, scratch_operands = 0 : i64, tpu.core_type = #tpu.core_type<tc>, window_params = [{transform_indices = @transform_0, window_bounds = array<i64: 2, 16>}, {transform_indices = @transform_1, window_bounds = array<i64: 2>}, {transform_indices = @transform_2, window_bounds = array<i64: 2, 15>}]} {
    %c0 = arith.constant 0 : index
    %c0_0 = arith.constant 0 : index
    %0 = vector.load %arg1[%c0, %c0_0] : memref<2x16xf32, #tpu.memory_space<vmem>>, vector<2x16xf32>
    %c0_1 = arith.constant 0 : index
    %1 = memref.load %arg2[%c0_1] : memref<2xf32, #tpu.memory_space<smem>>
    %c1 = arith.constant 1 : index
    %2 = memref.load %arg2[%c1] : memref<2xf32, #tpu.memory_space<smem>>
    %3 = vector.extract_strided_slice %0 {offsets = [0, 0], sizes = [2, 15], strides = [1, 1]} : vector<2x16xf32> to vector<2x15xf32>
    %4 = vector.broadcast %1 : f32 to vector<2x15xf32>
    %5 = arith.mulf %4, %3 : vector<2x15xf32>
    %6 = vector.extract_strided_slice %0 {offsets = [0, 1], sizes = [2, 15], strides = [1, 1]} : vector<2x16xf32> to vector<2x15xf32>
    %7 = vector.broadcast %2 : f32 to vector<2x15xf32>
    %8 = arith.mulf %7, %6 : vector<2x15xf32>
    %9 = arith.addf %5, %8 : vector<2x15xf32>
    %c0_2 = arith.constant 0 : index
    %c0_3 = arith.constant 0 : index
    %10 = vector.load %arg3[%c0_2, %c0_3] : memref<2x15xf32, #tpu.memory_space<vmem>>, vector<2x15xf32>
    tpu.vector_store %arg3[%c0_2, %c0_3], %9 {strides = array<i32>} : memref<2x15xf32, #tpu.memory_space<vmem>>, vector<2x15xf32>,
    return
  }
  func.func @transform_0(%arg0: i32) -> (i32, i32) {
    %c0_i32 = arith.constant 0 : i32
    %c0_i32_0 = arith.constant 0 : i32
    return %arg0, %c0_i32 : i32, i32
  }
  func.func @transform_1(%arg0: i32) -> i32 {
    %c0_i32 = arith.constant 0 : i32
    %c0_i32_0 = arith.constant 0 : i32
    return %c0_i32 : i32
  }
  func.func @transform_2(%arg0: i32) -> (i32, i32) {
    %c0_i32 = arith.constant 0 : i32
    %c0_i32_0 = arith.constant 0 : i32
    return %arg0, %c0_i32 : i32, i32
  }
}

</mosaic_0001>

<bundles_post_ra>
// kernel: tpu_custom_call.1
= control target key start
LH: loop header
LB: loop body
LE: loop exit
PB: predicated region body
PF: predicated region fallthrough
CT: control target
= control target key end

     0   :  { %7 = vsyncpa [#allocation3], 0  ;;  %s180_s0 = inlined_call_operand.hbm [shape: f32[2,16], index: 0, kind: input, shape index: {}]   ;;  %s181_s1 = inlined_call_operand.vmem [shape: f32[2], index: 1, kind: input, shape index: {}]   ;;  %s182_s2 = inlined_call_operand.hbm [shape: f32[2,15], index: 2, kind: output, shape index: {}]  }
   0x1   :  { %8 = vsyncpa [#allocation5], 0 }
   0x2   :  { %9 = vsyncpa [#allocation4], 0  ;;  %s26_s11 = sshll.u32 %s181_s1, 4  ;;  %s134_s12 = smov [#allocation2]   ;;  %s27_s11 = int_to_ptr.vmem [resolvable:$true] %s26_s11 }
   0x3   :  { %s16_s13 = sshll.u32 %s134_s12, 4  ;;  %s72_s16 = scalar_lea.hbm %s180_s0, 32  ;;  %s17_s13 = int_to_ptr.vmem [resolvable:$true] %s16_s13 }
   0x4   :  { %p73_p0 = scmp.ne.s32.totalorder %s180_s0, %s72_s16  ;;  %p76_p1 = scmp.lt.u32.totalorder %s72_s16, %s180_s0 }
   0x6   :  { %p78_p2 = pnand %p76_p1, %p73_p0 }
   0x8   :  { %81 = shalt.err (!%p78_p2)
}
   0x9   :  { %s82_s21 = scalar_lea.vmem %s17_s13, 32  ;;  %p87_p4 = scmp.lt.s32.totalorder %s17_s13, %s17_s13 }
   0xa   :  { %p83_p3 = scmp.ne.s32.totalorder %s17_s13, %s82_s21  ;;  %p88_p5 = scmp.lt.s32.totalorder %s82_s21, %s82_s21 }
   0xc   :  { %p89_p6 = por %p88_p5, %p87_p4 }
   0xe   :  { %p90_p7 = pnand %p89_p6, %p83_p3 }
  0x10   :  { %93 = shalt.err (!%p90_p7)
}
  0x11   :  { %19 = dma.hbm_to_vmem [thread:$0]  %s180_s0, 32, %s17_s13, [#allocation3]  }
  0x12   :  { %s94_s23 = scalar_lea.vmem %s27_s11, 16  ;;  %p99_p9 = scmp.lt.s32.totalorder %s27_s11, %s27_s11 }
  0x13   :  { %p95_p8 = scmp.ne.s32.totalorder %s27_s11, %s94_s23  ;;  %p100_p10 = scmp.lt.s32.totalorder %s94_s23, %s94_s23 }
  0x15   :  { %p101_p11 = por %p100_p10, %p99_p9 }
  0x17   :  { %p102_p12 = pnand %p101_p11, %p95_p8 }
  0x19   :  { %105 = shalt.err (!%p102_p12)
}
  0x1a   :  { %s135_s24 = smov [#allocation6]  }
  0x1b   :  { %29 = dma.vmem_to_smem %s27_s11, 16, %s135_s24, [#allocation5]  }
  0x1c   :  { %128 = dma.done.wait [#allocation3], 32  }
  0x1d   :  { %129 = vsyncadd [#allocation3], 4294967264 }
  0x1e   :  { %130 = dma.done.wait [#allocation5], 16  }
  0x1f   :  { %131 = vsyncadd [#allocation5], 4294967280 }
  0x20   :  { %36 = sfence }
  0x21   :  { %s67_s25 = sld [smem:[#allocation6 + $0x1]]  ;;  %v37_v0 = vld [vmem:[#allocation2] sm:$0x3]  ;;  %s136_s26 = smov 127   ;;  %vm49_vm0 = vcmask 115712  }
  0x22   :  { %s38_s0 = sld [smem:[#allocation6]]  ;;  %s137_s27 = smov [#allocation7]  }
  0x23   :  { %s57_s28 = sshll.u32 %s137_s27, 4  ;;  %s58_s28 = int_to_ptr.vmem [resolvable:$true] %s57_s28 }
  0x24   :  { %s106_s29 = scalar_lea.vmem %s58_s28, 32  ;;  %p111_p0 = scmp.lt.s32.totalorder %s58_s28, %s58_s28 }
  0x25   :  { %p107_p13 = scmp.ne.s32.totalorder %s58_s28, %s106_s29  ;;  %p112_p1 = scmp.lt.s32.totalorder %s106_s29, %s106_s29 }
  0x27   :  { %v42_v1 = vstv %s67_s25  ;;  %p113_p2 = por %p112_p1, %p111_p0 }
  0x28   :  { %v43_v2 = vmul.f32 %v42_v1, %v37_v0  ;;  %v40_v3 = vstv %s38_s0 }
  0x29   :  { %v41_v4 = vmul.f32 %v40_v3, %v37_v0  ;;  %p114_p3 = pnand %p113_p2, %p107_p13 }
  0x2a   :  { %45 = vrot.lane.b32.xlu0 %v43_v2, %s136_s26 }
  0x9c   :  { %v46_v5 = vpop.permute.xlu0 %45 }
  0x9d   :  { %v48_v6 = vadd.f32 %v46_v5, %v41_v4 }
  0x9f   :  { %50 = vst.msk [vmem:[#allocation7] sm:$0x3] %vm49_vm0, %v48_v6 }
  0xa0   :  { %117 = shalt.err (!%p114_p3)
}
  0xa1   :  { %s118_s4 = scalar_lea.hbm %s182_s2, 32 }
  0xa2   :  { %p119_p4 = scmp.ne.s32.totalorder %s182_s2, %s118_s4  ;;  %p122_p5 = scmp.lt.u32.totalorder %s118_s4, %s182_s2 }
  0xa4   :  { %p124_p6 = pnand %p122_p5, %p119_p4 }
  0xa6   :  { %127 = shalt.err (!%p124_p6)
}
  0xa7   :  { %60 = dma.vmem_to_hbm [thread:$0]  %s58_s28, 32, %s182_s2, [#allocation4]  }
  0xa8   :  { %132 = dma.done.wait [#allocation4], 32  }
  0xa9   :  { %133 = vsyncadd [#allocation4], 4294967264 }
  0xaa   :  { %64 = vsyncpa [#allocation3], 1 }
  0xab   :  { %65 = vsyncpa [#allocation4], 1 }
  0xac   :  { %66 = vsyncpa [#allocation5], 1 }

</bundles_post_ra>
